<compile_context>
chip_gen: v5e
topology: v5e:2x2
jax: 0.10.0
libtpu: 0.0.40
codegen_flags: <defaults>
</compile_context>

<pallas_src>
import functools

import jax
import jax.numpy as jnp
import numpy as np
from jax.experimental import pallas as pl
from jax.experimental.pallas import tpu as pltpu


def _round_up(x, m):
    return (x + m - 1) // m * m


def _se3_norm_flatten_kernel(*refs, n_parts, part_dims, col_offsets, inv_s):
    """refs = (x_ref_0..x_ref_{P-1}, o_ref, acc_0..acc_{P-1}).

    x_ref_p : (1, s_tile, F_p) with F_p = M_p * C_p * 2, lane order (m, c, re/im)
    o_ref   : (1, 1, C_pad)
    acc_p   : (1, 1, F_p) float32 scratch (spatial-sum accumulator)
    """
    x_refs = refs[:n_parts]
    o_ref = refs[n_parts]
    acc_refs = refs[n_parts + 1:]

    s = pl.program_id(1)

    @pl.when(s == 0)
    def _init():
        for acc in acc_refs:
            acc[...] = jnp.zeros_like(acc)

    # Partial spatial sums: (1, s_tile, F) -> (1, 1, F), accumulated across the
    # "arbitrary" S axis in VMEM-resident scratch.
    for x_ref, acc in zip(x_refs, acc_refs):
        acc[...] += jnp.sum(x_ref[...].astype(jnp.float32), axis=1, keepdims=True)

    @pl.when(s == pl.num_programs(1) - 1)
    def _finalize():
        o_ref[...] = jnp.zeros_like(o_ref)  # clears the lane padding beyond sum_C
        for (M, C), off, acc in zip(part_dims, col_offsets, acc_refs):
            a = acc[...]          # (1, 1, F), F = M*C*2
            sq = a * a
            C2 = 2 * C
            # Sum over m: M contiguous static lane slices of width 2*C.
            per_cr = sq[:, :, 0:C2]
            for m in range(1, M):
                per_cr = per_cr + sq[:, :, m * C2:(m + 1) * C2]
            # Sum re/im pairs, sqrt; fold the mean's 1/S into the final scale
            # (sqrt(sum((a/S)^2)) == sqrt(sum(a^2)) / S).
            for c in range(C):
                s_c = (per_cr[:, :, 2 * c:2 * c + 1]
                       + per_cr[:, :, 2 * c + 1:2 * c + 2])
                o_ref[:, :, off + c:off + c + 1] = jnp.sqrt(s_c) * inv_s


def se3_norm_flatten(parts, *, s_tile_max=512, vmem_limit_bytes=32 * 1024 * 1024):
    """parts: list of (B, X, Y, Z, 2l+1, C_l, 2) float32 arrays (last dim = re/im).

    Returns (B, sum_l C_l) float32, matching SE3NormFlatten.forward.
    """
    n_parts = len(parts)
    B = parts[0].shape[0]

    flat, part_dims = [], []
    for p in parts:
        B_, X, Y, Z, M, C, two = p.shape
        assert two == 2 and B_ == B
        # Contiguity-preserving reshape (no HBM transpose): (B, S, M*C*2)
        flat.append(p.reshape(B, X * Y * Z, M * C * 2))
        part_dims.append((M, C))
    S = flat[0].shape[1]
    for f in flat:
        assert f.shape[1] == S
    inv_s = 1.0 / S

    # S tiling: whole S for small problems; otherwise a large multiple-of-8 tile,
    # zero-padding the tail (zeros don't affect the sum; mean uses the true S).
    # For production sizes, pick s_tile so 2 * s_tile * sum(F_l) * 4B + accumulators
    # stays within ~50-75% of the scoped VMEM limit (halve for v7x's 64 MiB VMEM).
    if S <= s_tile_max:
        s_tile = _round_up(S, 8)
    else:
        s_tile = s_tile_max
    S_pad = _round_up(S, s_tile)
    if S_pad != S:
        flat = [jnp.pad(f, ((0, 0), (0, S_pad - S), (0, 0))) for f in flat]
    grid_s = S_pad // s_tile

    chans = [c for (_, c) in part_dims]
    sum_c = int(sum(chans))
    c_pad = _round_up(sum_c, 128)          # lane-dense output slab
    col_offsets = [int(v) for v in np.cumsum([0] + chans[:-1])]

    in_specs = [
        pl.BlockSpec((1, s_tile, f.shape[2]), lambda b, s: (b, s, 0)) for f in flat
    ]
    out_spec = pl.BlockSpec((1, 1, c_pad), lambda b, s: (b, 0, 0))
    scratch_shapes = [pltpu.VMEM((1, 1, f.shape[2]), jnp.float32) for f in flat]

    kernel = functools.partial(
        _se3_norm_flatten_kernel,
        n_parts=n_parts,
        part_dims=tuple(part_dims),
        col_offsets=tuple(col_offsets),
        inv_s=inv_s,
    )

    out = pl.pallas_call(
        kernel,
        out_shape=jax.ShapeDtypeStruct((B, 1, c_pad), jnp.float32),
        grid_spec=pltpu.PrefetchScalarGridSpec(
            num_scalar_prefetch=0,
            grid=(B, grid_s),                  # B parallel (2 TCs on v7x), S reduction
            in_specs=in_specs,
            out_specs=out_spec,
            scratch_shapes=scratch_shapes,
        ),
        compiler_params=pltpu.CompilerParams(
            dimension_semantics=("parallel", "arbitrary"),
            vmem_limit_bytes=vmem_limit_bytes,
        ),
    )(*flat)

    return out[:, 0, :sum_c]


def _reference(parts):
    """Pure-JAX reference mirroring the PyTorch forward (complex as trailing dim 2)."""
    outs = []
    for p in parts:
        mean = jnp.mean(p, axis=(1, 2, 3))                 # (B, M, C, 2)
        outs.append(jnp.sqrt(jnp.sum(mean * mean, axis=(1, 3))))   # (B, C)
    return jnp.concatenate(outs, axis=1)


if __name__ == "__main__":
    key = jax.random.PRNGKey(0)
    B, X, Y, Z = 2, 4, 4, 4
    tau = [4, 3, 2]  # channel multiplicities for l = 0, 1, 2

    parts = []
    for l, C in enumerate(tau):
        key, sub = jax.random.split(key)
        parts.append(
            jax.random.normal(sub, (B, X, Y, Z, 2 * l + 1, C, 2), dtype=jnp.float32)
        )

    out = se3_norm_flatten(parts)
    out = jax.block_until_ready(out)

    ref = _reference(parts)
    assert out.shape == (B, sum(tau))
    np.testing.assert_allclose(np.asarray(out), np.asarray(ref), rtol=1e-5, atol=1e-5)

    print("KERNEL_OK")
</pallas_src>

<mosaic_0001>
module attributes {stable_mosaic.version = 11 : i64} {
  func.func @_se3_norm_flatten_kernel(%arg0: i32, %arg1: i32, %arg2: memref<1x64x8xf32, #tpu.memory_space<vmem>>, %arg3: memref<1x64x18xf32, #tpu.memory_space<vmem>>, %arg4: memref<1x64x20xf32, #tpu.memory_space<vmem>>, %arg5: memref<1x1x128xf32, #tpu.memory_space<vmem>>, %arg6: memref<1x1x8xf32, #tpu.memory_space<vmem>>, %arg7: memref<1x1x18xf32, #tpu.memory_space<vmem>>, %arg8: memref<1x1x20xf32, #tpu.memory_space<vmem>>) attributes {dimension_semantics = [#tpu.dimension_semantics<parallel>, #tpu.dimension_semantics<arbitrary>], iteration_bounds = array<i64: 2, 1>, scalar_prefetch = 0 : i64, scratch_operands = 3 : i64, tpu.core_type = #tpu.core_type<tc>, window_params = [{transform_indices = @transform_0, window_bounds = array<i64: 1, 64, 8>}, {transform_indices = @transform_1, window_bounds = array<i64: 1, 64, 18>}, {transform_indices = @transform_2, window_bounds = array<i64: 1, 64, 20>}, {transform_indices = @transform_3, window_bounds = array<i64: 1, 1, 128>}]} {
    %c0_i32 = arith.constant 0 : i32
    %0 = arith.cmpi eq, %arg1, %c0_i32 : i32
    %1 = arith.extui %0 : i1 to i32
    %c0_i32_0 = arith.constant 0 : i32
    %2 = arith.cmpi ne, %1, %c0_i32_0 : i32
    scf.if %2 {
      %cst_31 = arith.constant 0.000000e+00 : f32
      %24 = vector.broadcast %cst_31 : f32 to vector<1x1x8xf32>
      %c0_32 = arith.constant 0 : index
      %c0_33 = arith.constant 0 : index
      %c0_34 = arith.constant 0 : index
      %25 = vector.load %arg6[%c0_32, %c0_33, %c0_34] : memref<1x1x8xf32, #tpu.memory_space<vmem>>, vector<1x1x8xf32>
      tpu.vector_store %arg6[%c0_32, %c0_33, %c0_34], %24 {strides = array<i32>} : memref<1x1x8xf32, #tpu.memory_space<vmem>>, vector<1x1x8xf32>,
      %cst_35 = arith.constant 0.000000e+00 : f32
      %26 = vector.broadcast %cst_35 : f32 to vector<1x1x18xf32>
      %c0_36 = arith.constant 0 : index
      %c0_37 = arith.constant 0 : index
      %c0_38 = arith.constant 0 : index
      %27 = vector.load %arg7[%c0_36, %c0_37, %c0_38] : memref<1x1x18xf32, #tpu.memory_space<vmem>>, vector<1x1x18xf32>
      tpu.vector_store %arg7[%c0_36, %c0_37, %c0_38], %26 {strides = array<i32>} : memref<1x1x18xf32, #tpu.memory_space<vmem>>, vector<1x1x18xf32>,
      %cst_39 = arith.constant 0.000000e+00 : f32
      %28 = vector.broadcast %cst_39 : f32 to vector<1x1x20xf32>
      %c0_40 = arith.constant 0 : index
      %c0_41 = arith.constant 0 : index
      %c0_42 = arith.constant 0 : index
      %29 = vector.load %arg8[%c0_40, %c0_41, %c0_42] : memref<1x1x20xf32, #tpu.memory_space<vmem>>, vector<1x1x20xf32>
      tpu.vector_store %arg8[%c0_40, %c0_41, %c0_42], %28 {strides = array<i32>} : memref<1x1x20xf32, #tpu.memory_space<vmem>>, vector<1x1x20xf32>,
    } else {
    }
    %c0 = arith.constant 0 : index
    %c0_1 = arith.constant 0 : index
    %c0_2 = arith.constant 0 : index
    %3 = vector.load %arg6[%c0, %c0_1, %c0_2] : memref<1x1x8xf32, #tpu.memory_space<vmem>>, vector<1x1x8xf32>
    %c0_3 = arith.constant 0 : index
    %c0_4 = arith.constant 0 : index
    %c0_5 = arith.constant 0 : index
    %4 = vector.load %arg2[%c0_3, %c0_4, %c0_5] : memref<1x64x8xf32, #tpu.memory_space<vmem>>, vector<1x64x8xf32>
    %cst = arith.constant dense<0.000000e+00> : vector<1x8xf32>
    %5 = vector.multi_reduction <add>, %4, %cst [1] : vector<1x64x8xf32> to vector<1x8xf32>
    %6 = vector.shape_cast %5 : vector<1x8xf32> to vector<1x1x8xf32>
    %7 = arith.addf %3, %6 : vector<1x1x8xf32>
    %c0_6 = arith.constant 0 : index
    %c0_7 = arith.constant 0 : index
    %c0_8 = arith.constant 0 : index
    %8 = vector.load %arg6[%c0_6, %c0_7, %c0_8] : memref<1x1x8xf32, #tpu.memory_space<vmem>>, vector<1x1x8xf32>
    tpu.vector_store %arg6[%c0_6, %c0_7, %c0_8], %7 {strides = array<i32>} : memref<1x1x8xf32, #tpu.memory_space<vmem>>, vector<1x1x8xf32>,
    %c0_9 = arith.constant 0 : index
    %c0_10 = arith.constant 0 : index
    %c0_11 = arith.constant 0 : index
    %9 = vector.load %arg7[%c0_9, %c0_10, %c0_11] : memref<1x1x18xf32, #tpu.memory_space<vmem>>, vector<1x1x18xf32>
    %c0_12 = arith.constant 0 : index
    %c0_13 = arith.constant 0 : index
    %c0_14 = arith.constant 0 : index
    %10 = vector.load %arg3[%c0_12, %c0_13, %c0_14] : memref<1x64x18xf32, #tpu.memory_space<vmem>>, vector<1x64x18xf32>
    %cst_15 = arith.constant dense<0.000000e+00> : vector<1x18xf32>
    %11 = vector.multi_reduction <add>, %10, %cst_15 [1] : vector<1x64x18xf32> to vector<1x18xf32>
    %12 = vector.shape_cast %11 : vector<1x18xf32> to vector<1x1x18xf32>
    %13 = arith.addf %9, %12 : vector<1x1x18xf32>
    %c0_16 = arith.constant 0 : index
    %c0_17 = arith.constant 0 : index
    %c0_18 = arith.constant 0 : index
    %14 = vector.load %arg7[%c0_16, %c0_17, %c0_18] : memref<1x1x18xf32, #tpu.memory_space<vmem>>, vector<1x1x18xf32>
    tpu.vector_store %arg7[%c0_16, %c0_17, %c0_18], %13 {strides = array<i32>} : memref<1x1x18xf32, #tpu.memory_space<vmem>>, vector<1x1x18xf32>,
    %c0_19 = arith.constant 0 : index
    %c0_20 = arith.constant 0 : index
    %c0_21 = arith.constant 0 : index
    %15 = vector.load %arg8[%c0_19, %c0_20, %c0_21] : memref<1x1x20xf32, #tpu.memory_space<vmem>>, vector<1x1x20xf32>
    %c0_22 = arith.constant 0 : index
    %c0_23 = arith.constant 0 : index
    %c0_24 = arith.constant 0 : index
    %16 = vector.load %arg4[%c0_22, %c0_23, %c0_24] : memref<1x64x20xf32, #tpu.memory_space<vmem>>, vector<1x64x20xf32>
    %cst_25 = arith.constant dense<0.000000e+00> : vector<1x20xf32>
    %17 = vector.multi_reduction <add>, %16, %cst_25 [1] : vector<1x64x20xf32> to vector<1x20xf32>
    %18 = vector.shape_cast %17 : vector<1x20xf32> to vector<1x1x20xf32>
    %19 = arith.addf %15, %18 : vector<1x1x20xf32>
    %c0_26 = arith.constant 0 : index
    %c0_27 = arith.constant 0 : index
    %c0_28 = arith.constant 0 : index
    %20 = vector.load %arg8[%c0_26, %c0_27, %c0_28] : memref<1x1x20xf32, #tpu.memory_space<vmem>>, vector<1x1x20xf32>
    tpu.vector_store %arg8[%c0_26, %c0_27, %c0_28], %19 {strides = array<i32>} : memref<1x1x20xf32, #tpu.memory_space<vmem>>, vector<1x1x20xf32>,
    %c0_i32_29 = arith.constant 0 : i32
    %21 = arith.cmpi eq, %arg1, %c0_i32_29 : i32
    %22 = arith.extui %21 : i1 to i32
    %c0_i32_30 = arith.constant 0 : i32
    %23 = arith.cmpi ne, %22, %c0_i32_30 : i32
    scf.if %23 {
      %cst_31 = arith.constant 0.000000e+00 : f32
      %24 = vector.broadcast %cst_31 : f32 to vector<1x1x128xf32>
      %c0_32 = arith.constant 0 : index
      %c0_33 = arith.constant 0 : index
      %c0_34 = arith.constant 0 : index
      %25 = vector.load %arg5[%c0_32, %c0_33, %c0_34] : memref<1x1x128xf32, #tpu.memory_space<vmem>>, vector<1x1x128xf32>
      tpu.vector_store %arg5[%c0_32, %c0_33, %c0_34], %24 {strides = array<i32>} : memref<1x1x128xf32, #tpu.memory_space<vmem>>, vector<1x1x128xf32>,
      %c0_35 = arith.constant 0 : index
      %c0_36 = arith.constant 0 : index
      %c0_37 = arith.constant 0 : index
      %26 = vector.load %arg6[%c0_35, %c0_36, %c0_37] : memref<1x1x8xf32, #tpu.memory_space<vmem>>, vector<1x1x8xf32>
      %27 = arith.mulf %26, %26 : vector<1x1x8xf32>
      %28 = vector.extract_strided_slice %27 {offsets = [0, 0, 0], sizes = [1, 1, 1], strides = [1, 1, 1]} : vector<1x1x8xf32> to vector<1x1x1xf32>
      %29 = vector.extract_strided_slice %27 {offsets = [0, 0, 1], sizes = [1, 1, 1], strides = [1, 1, 1]} : vector<1x1x8xf32> to vector<1x1x1xf32>
      %30 = arith.addf %28, %29 : vector<1x1x1xf32>
      %31 = math.sqrt %30 : vector<1x1x1xf32>
      %cst_38 = arith.constant 1.562500e-02 : f32
      %32 = vector.broadcast %cst_38 : f32 to vector<1x1x1xf32>
      %33 = arith.mulf %31, %32 : vector<1x1x1xf32>
      %c0_39 = arith.constant 0 : index
      %c0_40 = arith.constant 0 : index
      %c0_41 = arith.constant 0 : index
      %34 = vector.load %arg5[%c0_39, %c0_40, %c0_41] : memref<1x1x128xf32, #tpu.memory_space<vmem>>, vector<1x1x1xf32>
      tpu.vector_store %arg5[%c0_39, %c0_40, %c0_41], %33 {strides = array<i32>} : memref<1x1x128xf32, #tpu.memory_space<vmem>>, vector<1x1x1xf32>,
      %35 = vector.extract_strided_slice %27 {offsets = [0, 0, 2], sizes = [1, 1, 1], strides = [1, 1, 1]} : vector<1x1x8xf32> to vector<1x1x1xf32>
      %36 = vector.extract_strided_slice %27 {offsets = [0, 0, 3], sizes = [1, 1, 1], strides = [1, 1, 1]} : vector<1x1x8xf32> to vector<1x1x1xf32>
      %37 = arith.addf %35, %36 : vector<1x1x1xf32>
      %38 = math.sqrt %37 : vector<1x1x1xf32>
      %cst_42 = arith.constant 1.562500e-02 : f32
      %39 = vector.broadcast %cst_42 : f32 to vector<1x1x1xf32>
      %40 = arith.mulf %38, %39 : vector<1x1x1xf32>
      %c0_43 = arith.constant 0 : index
      %c0_44 = arith.constant 0 : index
      %c1 = arith.constant 1 : index
      %41 = vector.load %arg5[%c0_43, %c0_44, %c1] : memref<1x1x128xf32, #tpu.memory_space<vmem>>, vector<1x1x1xf32>
      tpu.vector_store %arg5[%c0_43, %c0_44, %c1], %40 {strides = array<i32>} : memref<1x1x128xf32, #tpu.memory_space<vmem>>, vector<1x1x1xf32>,
      %42 = vector.extract_strided_slice %27 {offsets = [0, 0, 4], sizes = [1, 1, 1], strides = [1, 1, 1]} : vector<1x1x8xf32> to vector<1x1x1xf32>
      %43 = vector.extract_strided_slice %27 {offsets = [0, 0, 5], sizes = [1, 1, 1], strides = [1, 1, 1]} : vector<1x1x8xf32> to vector<1x1x1xf32>
      %44 = arith.addf %42, %43 : vector<1x1x1xf32>
      %45 = math.sqrt %44 : vector<1x1x1xf32>
      %cst_45 = arith.constant 1.562500e-02 : f32
      %46 = vector.broadcast %cst_45 : f32 to vector<1x1x1xf32>
      %47 = arith.mulf %45, %46 : vector<1x1x1xf32>
      %c0_46 = arith.constant 0 : index
      %c0_47 = arith.constant 0 : index
      %c2 = arith.constant 2 : index
      %48 = vector.load %arg5[%c0_46, %c0_47, %c2] : memref<1x1x128xf32, #tpu.memory_space<vmem>>, vector<1x1x1xf32>
      tpu.vector_store %arg5[%c0_46, %c0_47, %c2], %47 {strides = array<i32>} : memref<1x1x128xf32, #tpu.memory_space<vmem>>, vector<1x1x1xf32>,
      %49 = vector.extract_strided_slice %27 {offsets = [0, 0, 6], sizes = [1, 1, 1], strides = [1, 1, 1]} : vector<1x1x8xf32> to vector<1x1x1xf32>
      %50 = vector.extract_strided_slice %27 {offsets = [0, 0, 7], sizes = [1, 1, 1], strides = [1, 1, 1]} : vector<1x1x8xf32> to vector<1x1x1xf32>
      %51 = arith.addf %49, %50 : vector<1x1x1xf32>
      %52 = math.sqrt %51 : vector<1x1x1xf32>
      %cst_48 = arith.constant 1.562500e-02 : f32
      %53 = vector.broadcast %cst_48 : f32 to vector<1x1x1xf32>
      %54 = arith.mulf %52, %53 : vector<1x1x1xf32>
      %c0_49 = arith.constant 0 : index
      %c0_50 = arith.constant 0 : index
      %c3 = arith.constant 3 : index
      %55 = vector.load %arg5[%c0_49, %c0_50, %c3] : memref<1x1x128xf32, #tpu.memory_space<vmem>>, vector<1x1x1xf32>
      tpu.vector_store %arg5[%c0_49, %c0_50, %c3], %54 {strides = array<i32>} : memref<1x1x128xf32, #tpu.memory_space<vmem>>, vector<1x1x1xf32>,
      %c0_51 = arith.constant 0 : index
      %c0_52 = arith.constant 0 : index
      %c0_53 = arith.constant 0 : index
      %56 = vector.load %arg7[%c0_51, %c0_52, %c0_53] : memref<1x1x18xf32, #tpu.memory_space<vmem>>, vector<1x1x18xf32>
      %57 = arith.mulf %56, %56 : vector<1x1x18xf32>
      %58 = vector.extract_strided_slice %57 {offsets = [0, 0, 0], sizes = [1, 1, 6], strides = [1, 1, 1]} : vector<1x1x18xf32> to vector<1x1x6xf32>
      %59 = vector.extract_strided_slice %57 {offsets = [0, 0, 6], sizes = [1, 1, 6], strides = [1, 1, 1]} : vector<1x1x18xf32> to vector<1x1x6xf32>
      %60 = arith.addf %58, %59 : vector<1x1x6xf32>
      %61 = vector.extract_strided_slice %57 {offsets = [0, 0, 12], sizes = [1, 1, 6], strides = [1, 1, 1]} : vector<1x1x18xf32> to vector<1x1x6xf32>
      %62 = arith.addf %60, %61 : vector<1x1x6xf32>
      %63 = vector.extract_strided_slice %62 {offsets = [0, 0, 0], sizes = [1, 1, 1], strides = [1, 1, 1]} : vector<1x1x6xf32> to vector<1x1x1xf32>
      %64 = vector.extract_strided_slice %62 {offsets = [0, 0, 1], sizes = [1, 1, 1], strides = [1, 1, 1]} : vector<1x1x6xf32> to vector<1x1x1xf32>
      %65 = arith.addf %63, %64 : vector<1x1x1xf32>
      %66 = math.sqrt %65 : vector<1x1x1xf32>
      %cst_54 = arith.constant 1.562500e-02 : f32
      %67 = vector.broadcast %cst_54 : f32 to vector<1x1x1xf32>
      %68 = arith.mulf %66, %67 : vector<1x1x1xf32>
      %c0_55 = arith.constant 0 : index
      %c0_56 = arith.constant 0 : index
      %c4 = arith.constant 4 : index
      %69 = vector.load %arg5[%c0_55, %c0_56, %c4] : memref<1x1x128xf32, #tpu.memory_space<vmem>>, vector<1x1x1xf32>
      tpu.vector_store %arg5[%c0_55, %c0_56, %c4], %68 {strides = array<i32>} : memref<1x1x128xf32, #tpu.memory_space<vmem>>, vector<1x1x1xf32>,
      %70 = vector.extract_strided_slice %62 {offsets = [0, 0, 2], sizes = [1, 1, 1], strides = [1, 1, 1]} : vector<1x1x6xf32> to vector<1x1x1xf32>
      %71 = vector.extract_strided_slice %62 {offsets = [0, 0, 3], sizes = [1, 1, 1], strides = [1, 1, 1]} : vector<1x1x6xf32> to vector<1x1x1xf32>
      %72 = arith.addf %70, %71 : vector<1x1x1xf32>
      %73 = math.sqrt %72 : vector<1x1x1xf32>
      %cst_57 = arith.constant 1.562500e-02 : f32
      %74 = vector.broadcast %cst_57 : f32 to vector<1x1x1xf32>
      %75 = arith.mulf %73, %74 : vector<1x1x1xf32>
      %c0_58 = arith.constant 0 : index
      %c0_59 = arith.constant 0 : index
      %c5 = arith.constant 5 : index
      %76 = vector.load %arg5[%c0_58, %c0_59, %c5] : memref<1x1x128xf32, #tpu.memory_space<vmem>>, vector<1x1x1xf32>
      tpu.vector_store %arg5[%c0_58, %c0_59, %c5], %75 {strides = array<i32>} : memref<1x1x128xf32, #tpu.memory_space<vmem>>, vector<1x1x1xf32>,
      %77 = vector.extract_strided_slice %62 {offsets = [0, 0, 4], sizes = [1, 1, 1], strides = [1, 1, 1]} : vector<1x1x6xf32> to vector<1x1x1xf32>
      %78 = vector.extract_strided_slice %62 {offsets = [0, 0, 5], sizes = [1, 1, 1], strides = [1, 1, 1]} : vector<1x1x6xf32> to vector<1x1x1xf32>
      %79 = arith.addf %77, %78 : vector<1x1x1xf32>
      %80 = math.sqrt %79 : vector<1x1x1xf32>
      %cst_60 = arith.constant 1.562500e-02 : f32
      %81 = vector.broadcast %cst_60 : f32 to vector<1x1x1xf32>
      %82 = arith.mulf %80, %81 : vector<1x1x1xf32>
      %c0_61 = arith.constant 0 : index
      %c0_62 = arith.constant 0 : index
      %c6 = arith.constant 6 : index
      %83 = vector.load %arg5[%c0_61, %c0_62, %c6] : memref<1x1x128xf32, #tpu.memory_space<vmem>>, vector<1x1x1xf32>
      tpu.vector_store %arg5[%c0_61, %c0_62, %c6], %82 {strides = array<i32>} : memref<1x1x128xf32, #tpu.memory_space<vmem>>, vector<1x1x1xf32>,
      %c0_63 = arith.constant 0 : index
      %c0_64 = arith.constant 0 : index
      %c0_65 = arith.constant 0 : index
      %84 = vector.load %arg8[%c0_63, %c0_64, %c0_65] : memref<1x1x20xf32, #tpu.memory_space<vmem>>, vector<1x1x20xf32>
      %85 = arith.mulf %84, %84 : vector<1x1x20xf32>
      %86 = vector.extract_strided_slice %85 {offsets = [0, 0, 0], sizes = [1, 1, 4], strides = [1, 1, 1]} : vector<1x1x20xf32> to vector<1x1x4xf32>
      %87 = vector.extract_strided_slice %85 {offsets = [0, 0, 4], sizes = [1, 1, 4], strides = [1, 1, 1]} : vector<1x1x20xf32> to vector<1x1x4xf32>
      %88 = arith.addf %86, %87 : vector<1x1x4xf32>
      %89 = vector.extract_strided_slice %85 {offsets = [0, 0, 8], sizes = [1, 1, 4], strides = [1, 1, 1]} : vector<1x1x20xf32> to vector<1x1x4xf32>
      %90 = arith.addf %88, %89 : vector<1x1x4xf32>
      %91 = vector.extract_strided_slice %85 {offsets = [0, 0, 12], sizes = [1, 1, 4], strides = [1, 1, 1]} : vector<1x1x20xf32> to vector<1x1x4xf32>
      %92 = arith.addf %90, %91 : vector<1x1x4xf32>
      %93 = vector.extract_strided_slice %85 {offsets = [0, 0, 16], sizes = [1, 1, 4], strides = [1, 1, 1]} : vector<1x1x20xf32> to vector<1x1x4xf32>
      %94 = arith.addf %92, %93 : vector<1x1x4xf32>
      %95 = vector.extract_strided_slice %94 {offsets = [0, 0, 0], sizes = [1, 1, 1], strides = [1, 1, 1]} : vector<1x1x4xf32> to vector<1x1x1xf32>
      %96 = vector.extract_strided_slice %94 {offsets = [0, 0, 1], sizes = [1, 1, 1], strides = [1, 1, 1]} : vector<1x1x4xf32> to vector<1x1x1xf32>
      %97 = arith.addf %95, %96 : vector<1x1x1xf32>
      %98 = math.sqrt %97 : vector<1x1x1xf32>
      %cst_66 = arith.constant 1.562500e-02 : f32
      %99 = vector.broadcast %cst_66 : f32 to vector<1x1x1xf32>
      %100 = arith.mulf %98, %99 : vector<1x1x1xf32>
      %c0_67 = arith.constant 0 : index
      %c0_68 = arith.constant 0 : index
      %c7 = arith.constant 7 : index
      %101 = vector.load %arg5[%c0_67, %c0_68, %c7] : memref<1x1x128xf32, #tpu.memory_space<vmem>>, vector<1x1x1xf32>
      tpu.vector_store %arg5[%c0_67, %c0_68, %c7], %100 {strides = array<i32>} : memref<1x1x128xf32, #tpu.memory_space<vmem>>, vector<1x1x1xf32>,
      %102 = vector.extract_strided_slice %94 {offsets = [0, 0, 2], sizes = [1, 1, 1], strides = [1, 1, 1]} : vector<1x1x4xf32> to vector<1x1x1xf32>
      %103 = vector.extract_strided_slice %94 {offsets = [0, 0, 3], sizes = [1, 1, 1], strides = [1, 1, 1]} : vector<1x1x4xf32> to vector<1x1x1xf32>
      %104 = arith.addf %102, %103 : vector<1x1x1xf32>
      %105 = math.sqrt %104 : vector<1x1x1xf32>
      %cst_69 = arith.constant 1.562500e-02 : f32
      %106 = vector.broadcast %cst_69 : f32 to vector<1x1x1xf32>
      %107 = arith.mulf %105, %106 : vector<1x1x1xf32>
      %c0_70 = arith.constant 0 : index
      %c0_71 = arith.constant 0 : index
      %c8 = arith.constant 8 : index
      %108 = vector.load %arg5[%c0_70, %c0_71, %c8] : memref<1x1x128xf32, #tpu.memory_space<vmem>>, vector<1x1x1xf32>
      tpu.vector_store %arg5[%c0_70, %c0_71, %c8], %107 {strides = array<i32>} : memref<1x1x128xf32, #tpu.memory_space<vmem>>, vector<1x1x1xf32>,
    } else {
    }
    return
  }
  func.func @transform_0(%arg0: i32, %arg1: i32) -> (i32, i32, i32) {
    %c0_i32 = arith.constant 0 : i32
    %c0_i32_0 = arith.constant 0 : i32
    return %arg0, %arg1, %c0_i32 : i32, i32, i32
  }
  func.func @transform_1(%arg0: i32, %arg1: i32) -> (i32, i32, i32) {
    %c0_i32 = arith.constant 0 : i32
    %c0_i32_0 = arith.constant 0 : i32
    return %arg0, %arg1, %c0_i32 : i32, i32, i32
  }
  func.func @transform_2(%arg0: i32, %arg1: i32) -> (i32, i32, i32) {
    %c0_i32 = arith.constant 0 : i32
    %c0_i32_0 = arith.constant 0 : i32
    return %arg0, %arg1, %c0_i32 : i32, i32, i32
  }
  func.func @transform_3(%arg0: i32, %arg1: i32) -> (i32, i32, i32) {
    %c0_i32 = arith.constant 0 : i32
    %c0_i32_0 = arith.constant 0 : i32
    %c0_i32_1 = arith.constant 0 : i32
    return %arg0, %c0_i32, %c0_i32_0 : i32, i32, i32
  }
}

</mosaic_0001>

<bundles_post_ra>
// kernel: tpu_custom_call.1
= control target key start
LH: loop header
LB: loop body
LE: loop exit
PB: predicated region body
PF: predicated region fallthrough
CT: control target
= control target key end

     0   :  { %8 = vsyncpa [#allocation6], 0  ;;  %s1024_s0 = inlined_call_operand.vmem [shape: f32[2,64,8], index: 0, kind: input, shape index: {}]   ;;  %s1025_s1 = inlined_call_operand.vmem [shape: f32[2,64,18], index: 1, kind: input, shape index: {}]   ;;  %s1026_s2 = inlined_call_operand.vmem [shape: f32[2,64,20], index: 2, kind: input, shape index: {}]   ;;  %s1027_s3 = inlined_call_operand.hbm [shape: f32[2,1,128], index: 3, kind: output, shape index: {}]  }
   0x1   :  { %10 = vsyncpa [#allocation6 + $0x1], 0  ;;  %s841_s12 = smov 0   ;;  %s843_s13 = smov 0  }
   0x2   :  { %s845_s14 = smov 0   ;;  %s847_s15 = smov 0  }
   0x3   :  { %s849_s16 = smov 0   ;;  %s851_s17 = smov 0  }
   0x4 LB: > { %s636_s18 = sadd.s32 4294967295, %s805_s17   ;;  %s637_s19 = sadd.s32 4294967294, %s805_s17   ;;  %s805_s17 = sphi %s851_s17, %s16_s17   ;;  %s801_s16 = sphi %s849_s16, %s1034_s16   ;;  %s797_s15 = sphi %s847_s15, %s1033_s15   ;;  %s793_s14 = sphi %s845_s14, %s1032_s14   ;;  %s789_s13 = sphi %s843_s13, %s1031_s13   ;;  %s785_s12 = sphi %s841_s12, %s1030_s12  }
   0x5   : > { %s28_s20 = sadd.s32 1, %s801_s16  ;;  %s119_s21 = sadd.s32 1, %s793_s14 }
   0x6   : > { %p30_p0 = scmp.ge.s32.totalorder %s28_s20, 2  ;;  %p129_p1 = scmp.ne.s32.totalorder %s793_s14, %s789_s13 }
   0x7   : > { %p130_p2 = scmp.eq.s32.totalorder %s636_s18, 1  ;;  %p135_p3 = scmp.ne.s32.totalorder %s789_s13, %s785_s12 }
   0x8   : > { %s1036_s20 = smov (%p30_p0, %s28_s20), 0  ;;  %p136_p5 = scmp.eq.s32.totalorder %s637_s19, 1 }
   0x9   : > { %p881_p4 = por %p130_p2, %p129_p1  ;;  %s116_s23 = ssub.s32 %s801_s16, %s1036_s20 }
   0xa   : > { %p640_p6 = scmp.ge.s32.totalorder %s805_s17, 1  ;;  %p117_p7 = scmp.eq.s32.totalorder %s116_s23, 0 }
   0xb   : > { %p888_p8 = por %p136_p5, %p135_p3  ;;  %p193_p9 = scmp.lt.s32.totalorder %s805_s17, 3 }
   0xc   : > { %s894_s25 = scalar_select %p117_p7, %s793_s14, %s119_s21  }
   0xd   : > { %p194_p10 = pnand %p640_p6, %p193_p9 }
   0xe   : > { %p239_p11 = scmp.lt.s32.totalorder (!%p194_p10), %s797_s15, 1  ;;  %s808_s10 = smov (!%p194_p10), 124  }
   0xf   : > { %197 = sbr.rel (%p194_p10) target bundleno = 461 (0x1cd), region = 32  ;;  %s809_s11 = smov (!%p194_p10), 120  }
  0x10   : > { %s810_s18 = smov (!%p194_p10), 116   ;;  %s811_s19 = smov (!%p194_p10), 122  }
  0x11   : > { %s812_s21 = smov (!%p194_p10), 112   ;;  %s813_s23 = smov (!%p194_p10), 127  }
  0x12   : > { %s814_s28 = smov (!%p194_p10), 126   ;;  %s815_s29 = smov (!%p194_p10), 125  }
  0x13   : > { %s817_s4 = smov (!%p194_p10), 3   ;;  %s818_s5 = smov (!%p194_p10), 4  }
  0x14   : > { %vm276_vm0 = vcmask 155648   ;;  %v807_v0 = vmov 0.0   ;;  %vm274_vm1 = vcmask 139264   ;;  %s240_s26 = scalar_select %p239_p11, %s797_s15, 1  ;;  %vm355_vm2 = vcmask 162816  }
  0x15   : > { %277 = vst.msk [vmem:[#allocation4] sm:$0x1] %vm276_vm0, %v807_v0  ;;  %vm321_vm3 = vcmask 146432   ;;  %vm272_vm4 = vcmask 57344   ;;  %vm287_vm5 = vcmask 64512   ;;  %vm404_vm8 = vcmask 0  }
  0x16   : > { %275 = vst.msk [vmem:[#allocation3] sm:$0x1] %vm274_vm1, %v807_v0  ;;  %s902_s27 = sshll.u32 %s240_s26, 6  ;;  %s236_s26 = sand.u32 1, %s789_s13   ;;  %vm411_vm13 = vcmask 8200   ;;  %vm416_vm14 = vcmask 16400  }
  0x17   : > { %s266_s30 = scalar_lea.vmem %s1026_s2, %s902_s27  ;;  %s912_s6 = scalar_lea.vmem %s1025_s1, %s902_s27  ;;  %273 = vst.msk [vmem:[#allocation2] sm:$0x1] %vm272_vm4, %v807_v0  ;;  %vm421_vm15 = vcmask 24600  }
  0x18   : > { %v347_v1 = vld [vmem:[%s266_s30] sm:$0xff]  ;;  %v348_v2 = vld [vmem:[%s266_s30 + $0x8] sm:$0xff]  ;;  %v349_v3 = vld [vmem:[%s266_s30 + $0x10] sm:$0xff]  ;;  %s941_s9 = scalar_lea.vmem %s1024_s0, %s902_s27  ;;  %s969_s27 = scalar_lea.vmem [#allocation5], %s236_s26 }
  0x19   : > { %v350_v4 = vld [vmem:[%s266_s30 + $0x18] sm:$0xff]  ;;  %v356_v5 = vsel %vm355_vm2, %v347_v1, 0.0  ;;  %v357_v6 = vsel %vm355_vm2, %v348_v2, 0.0  ;;  %v359_v7 = vsel %vm355_vm2, %v349_v3, 0.0  ;;  %v351_v8 = vld [vmem:[%s266_s30 + $0x20] sm:$0xff]  ;;  %v352_v10 = vld [vmem:[%s266_s30 + $0x28] sm:$0xff] }
  0x1a   : > { %v358_v9 = vadd.f32 %v357_v6, %v356_v5  ;;  %v361_v11 = vsel %vm355_vm2, %v350_v4, 0.0  ;;  %v313_v12 = vld [vmem:[%s912_s6] sm:$0xff]  ;;  %v314_v14 = vld [vmem:[%s912_s6 + $0x8] sm:$0xff]  ;;  %v315_v15 = vld [vmem:[%s912_s6 + $0x10] sm:$0xff]  ;;  %v363_v18 = vsel %vm355_vm2, %v351_v8, 0.0  ;;  %v365_v25 = vsel %vm355_vm2, %v352_v10, 0.0 }
  0x1b   : > { %v316_v16 = vld [vmem:[%s912_s6 + $0x18] sm:$0xff]  ;;  %v322_v17 = vsel %vm321_vm3, %v313_v12, 0.0  ;;  %v323_v19 = vsel %vm321_vm3, %v314_v14, 0.0  ;;  %v325_v20 = vsel %vm321_vm3, %v315_v15, 0.0  ;;  %v353_v21 = vld [vmem:[%s266_s30 + $0x30] sm:$0xff]  ;;  %v317_v23 = vld [vmem:[%s912_s6 + $0x20] sm:$0xff] }
  0x1c   : > { %v360_v13 = vadd.f32 %v359_v7, %v358_v9  ;;  %v324_v24 = vadd.f32 %v323_v19, %v322_v17  ;;  %v327_v26 = vsel %vm321_vm3, %v316_v16, 0.0  ;;  %v354_v27 = vld [vmem:[%s266_s30 + $0x38] sm:$0xff]  ;;  %v318_v29 = vld [vmem:[%s912_s6 + $0x28] sm:$0xff]  ;;  %v367_v31 = vsel %vm355_vm2, %v353_v21, 0.0  ;;  %v319_v34 = vld [vmem:[%s912_s6 + $0x30] sm:$0xff]  ;;  %383 = vst [vmem:[%s969_s27] sm:$0x1] %v807_v0 }
  0x1d   : > { %v329_v32 = vsel %vm321_vm3, %v317_v23, 0.0  ;;  %v369_v36 = vsel %vm355_vm2, %v354_v27, 0.0  ;;  %v331_v37 = vsel %vm321_vm3, %v318_v29, 0.0  ;;  %v320_v39 = vld [vmem:[%s912_s6 + $0x38] sm:$0xff]  ;;  %v333_v41 = vsel %vm321_vm3, %v319_v34, 0.0  ;;  %v279_v47 = vld [vmem:[%s941_s9] sm:$0xff] }
  0x1e   : > { %v362_v22 = vadd.f32 %v361_v11, %v360_v13  ;;  %v326_v30 = vadd.f32 %v325_v20, %v324_v24  ;;  %v335_v44 = vsel %vm321_vm3, %v320_v39, 0.0  ;;  %v280_v48 = vld [vmem:[%s941_s9 + $0x8] sm:$0xff]  ;;  %v281_v49 = vld [vmem:[%s941_s9 + $0x10] sm:$0xff]  ;;  %v282_v52 = vld [vmem:[%s941_s9 + $0x18] sm:$0xff]  ;;  %v288_v53 = vsel %vm287_vm5, %v279_v47, 0.0  ;;  %s816_s30 = smov 2  }
  0x1f   : > { %v289_v54 = vsel %vm287_vm5, %v280_v48, 0.0  ;;  %v291_v55 = vsel %vm287_vm5, %v281_v49, 0.0  ;;  %v283_v58 = vld [vmem:[%s941_s9 + $0x20] sm:$0xff]  ;;  %v293_v60 = vsel %vm287_vm5, %v282_v52, 0.0  ;;  %v284_v63 = vld [vmem:[%s941_s9 + $0x28] sm:$0xff]  ;;  %v285_v5 = vld [vmem:[%s941_s9 + $0x30] sm:$0xff] }
  0x20   : > { %v364_v28 = vadd.f32 %v363_v18, %v362_v22  ;;  %v328_v35 = vadd.f32 %v327_v26, %v326_v30  ;;  %v290_v59 = vadd.f32 %v289_v54, %v288_v53  ;;  %v295_v2 = vsel %vm287_vm5, %v283_v58, 0.0  ;;  %v346_v7 = vld [vmem:[#allocation4] sm:$0x1]  ;;  %v286_v11 = vld [vmem:[%s941_s9 + $0x38] sm:$0xff]  ;;  %v312_v17 = vld [vmem:[#allocation3] sm:$0x1] }
  0x21   : > { %v297_v8 = vsel %vm287_vm5, %v284_v63, 0.0  ;;  %v299_v13 = vsel %vm287_vm5, %v285_v5, 0.0  ;;  %v301_v18 = vsel %vm287_vm5, %v286_v11, 0.0  ;;  %s819_s6 = smov 6   ;;  %s820_s7 = smov 7   ;;  %vm467_vm2 = vcmask 49200  }
  0x22   : > { %v366_v33 = vadd.f32 %v365_v25, %v364_v28  ;;  %v330_v40 = vadd.f32 %v329_v32, %v328_v35  ;;  %v292_v1 = vadd.f32 %v291_v55, %v290_v59  ;;  %vm511_vm3 = vcmask 57400  }
  0x24   : > { %v368_v38 = vadd.f32 %v367_v31, %v366_v33  ;;  %v332_v43 = vadd.f32 %v331_v37, %v330_v40  ;;  %v294_v6 = vadd.f32 %v293_v60, %v292_v1  ;;  %v278_v31 = vld [vmem:[#allocation2] sm:$0x1] }
  0x26   : > { %v370_v42 = vadd.f32 %v369_v36, %v368_v38  ;;  %v334_v46 = vadd.f32 %v333_v41, %v332_v43  ;;  %v296_v12 = vadd.f32 %v295_v2, %v294_v6 }
  0x28   : > { %v371_v45 = vrot.slane %v370_v42, 4  ;;  %v336_v51 = vadd.f32 %v335_v44, %v334_v46  ;;  %v298_v16 = vadd.f32 %v297_v8, %v296_v12 }
  0x2a   : > { %v372_v50 = vadd.f32 %v371_v45, %v370_v42  ;;  %v337_v57 = vrot.slane %v336_v51, 4  ;;  %v300_v20 = vadd.f32 %v299_v13, %v298_v16 }
  0x2c   : > { %v373_v56 = vrot.slane %v372_v50, 2  ;;  %v338_v62 = vadd.f32 %v337_v57, %v336_v51  ;;  %v302_v22 = vadd.f32 %v301_v18, %v300_v20 }
  0x2e   : > { %v374_v61 = vadd.f32 %v373_v56, %v372_v50  ;;  %v339_v4 = vrot.slane %v338_v62, 2  ;;  %v303_v23 = vrot.slane %v302_v22, 4 }
  0x30   : > { %v375_v3 = vrot.slane %v374_v61, 1  ;;  %v340_v10 = vadd.f32 %v339_v4, %v338_v62  ;;  %v304_v24 = vadd.f32 %v303_v23, %v302_v22 }
  0x32   : > { %v376_v9 = vadd.f32 %v375_v3, %v374_v61  ;;  %v341_v15 = vrot.slane %v340_v10, 1  ;;  %v305_v27 = vrot.slane %v304_v24, 2 }
  0x34   : > { %v377_v14 = vadd.f32 %v376_v9, %v346_v7  ;;  %v342_v19 = vadd.f32 %v341_v15, %v340_v10  ;;  %v306_v28 = vadd.f32 %v305_v27, %v304_v24 }
  0x36   : > { %379 = vst.msk [vmem:[#allocation4] sm:$0x1] %vm276_vm0, %v377_v14  ;;  %v343_v21 = vadd.f32 %v342_v19, %v312_v17  ;;  %v307_v30 = vrot.slane %v306_v28, 1  ;;  %vm457_vm0 = vcmask 32800  }
  0x38   : > { %345 = vst.msk [vmem:[#allocation3] sm:$0x1] %vm274_vm1, %v343_v21  ;;  %v308_v33 = vadd.f32 %v307_v30, %v306_v28  ;;  %vm462_vm1 = vcmask 41000  }
  0x3a   : > { %v309_v34 = vadd.f32 %v308_v33, %v278_v31 }
  0x3c   : > { %311 = vst.msk [vmem:[#allocation2] sm:$0x1] %vm272_vm4, %v309_v34  ;;  %vm516_vm4 = vcmask 65600  }
  0x3d   : > { %v469_v25 = vld [vmem:[#allocation4] sm:$0x1] }
  0x3e   : > { %v470_v26 = vmul.f32 %v469_v25, %v469_v25 }
  0x3f   : > { %v423_v29 = vld [vmem:[#allocation3] sm:$0x1] }
  0x40   : > { %472 = vrot.lane.b32.xlu0 %v470_v26, %s808_s10  ;;  %476 = vrot.lane.b32.xlu1 %v470_v26, %s809_s11  ;;  %v424_v32 = vmul.f32 %v423_v29, %v423_v29  ;;  %s527_s10 = scalar_lea.hbm %s1027_s3, %s797_s15  ;;  %s529_s11 = sshll.u32 %s969_s27, 4  ;;  %s530_s11 = int_to_ptr.vmem [resolvable:$true] %s529_s11 }
  0x41   : > { %480 = vrot.lane.b32.xlu2 %v470_v26, %s810_s18 }
  0x43   : > { %v384_v35 = vld [vmem:[#allocation2] sm:$0x1] }
  0x44   : > { %v385_v36 = vmul.f32 %v384_v35, %v384_v35 }
  0x48   : > { %426 = vrot.lane.b32.xlu0 %v424_v32, %s811_s19  ;;  %430 = vrot.lane.b32.xlu1 %v424_v32, %s810_s18  ;;  %s531_s18 = sshll.u32 %s527_s10, 4  ;;  %s519_s19 = scalar_lea.sflag [#allocation6], %s236_s26  ;;  %s532_s18 = int_to_ptr.hbm [resolvable:$true] %s531_s18 }
  0x49   : > { %484 = vrot.lane.b32.xlu2 %v470_v26, %s812_s21  ;;  %s741_s21 = sshra.s32 %s532_s18, 4  ;;  %s742_s21 = int_to_ptr.hbm [resolvable:$true] %s741_s21 }
  0x4a   : > { %p748_p1 = scmp.lt.s32.totalorder %s742_s21, %s1027_s3 }
  0x50   : > { %387 = vrot.lane.b32.xlu0 %v385_v36, %s813_s23 }
  0x9b   : > { %v481_v37 = vpop.permute.xlu2 %480 }
  0xa3   : > { %v485_v42 = vpop.permute.xlu2 %484 }
  0xb2   : > { %v473_v38 = vpop.permute.xlu0 %472  ;;  %v477_v39 = vpop.permute.xlu1 %476 }
  0xb3   : > { %v475_v40 = vadd.f32 %v473_v38, %v470_v26 }
  0xb5   : > { %v479_v41 = vadd.f32 %v477_v39, %v475_v40 }
  0xb7   : > { %v483_v43 = vadd.f32 %v481_v37, %v479_v41 }
  0xb9   : > { %v487_v44 = vadd.f32 %v485_v42, %v483_v43 }
  0xba   : > { %v427_v45 = vpop.permute.xlu0 %426  ;;  %v431_v46 = vpop.permute.xlu1 %430 }
  0xbb   : > { %v429_v47 = vadd.f32 %v427_v45, %v424_v32  ;;  %489 = vrot.lane.b32.xlu2 %v487_v44, %s813_s23 }
  0xbd   : > { %v433_v48 = vadd.f32 %v431_v46, %v429_v47 }
  0xbf   : > { %435 = vrot.lane.b32.xlu1 %v433_v48, %s813_s23 }
  0xc2   : > { %v388_v49 = vpop.permute.xlu0 %387 }
  0xc3   : > { %v390_v50 = vadd.f32 %v388_v49, %v385_v36 }
  0xc5   : > { %721 = vrsqrt.f32 %v390_v50  ;;  %vm398_vm6 = vcmp.eq.f32.partialorder %v390_v50, inf  ;;  %v401_v57 = vand.u32 2147483648, %v390_v50  ;;  %vm400_vm7 = vcmp.eq.f32.partialorder %v390_v50, 0.0 }
  0xcb   : > { %v722_v51 = vpop.eup %721 }
  0xcc   : > { %v392_v0 = vmul.f32 %v722_v51, %v390_v50 }
  0xce   : > { %v393_v52 = vmul.f32 %v722_v51, %v392_v0 }
  0xd0   : > { %v394_v53 = vmul.f32 0.5, %v393_v52 }
  0xd2   : > { %v395_v54 = vsub.f32 1.5, %v394_v53 }
  0xd4   : > { %v396_v55 = vmul.f32 %v722_v51, %v395_v54 }
  0xd6   : > { %v397_v56 = vmul.f32 %v396_v55, %v390_v50 }
  0xd8   : > { %v399_v58 = vsel %vm398_vm6, %v390_v50, %v397_v56 }
  0xd9   : > { %v402_v59 = vsel %vm400_vm7, %v401_v57, %v399_v58 }
  0xda   : > { %v403_v60 = vmul.f32 0.015625, %v402_v59 }
  0xdc   : > { %v407_v61 = vperm.slane %v403_v60, 0  ;;  %405 = vst.msk [vmem:[%s969_s27] sm:$0x1] %vm404_vm8, %v403_v60 }
  0xde   : > { %408 = vrot.lane.b32.xlu0 %v407_v61, %s813_s23  ;;  %413 = vrot.lane.b32.xlu1 %v407_v61, %s814_s28  ;;  %s743_s23 = scalar_lea.hbm %s742_s21, 1 }
  0xdf   : > { %418 = vrot.lane.b32.xlu2 %v407_v61, %s815_s29  ;;  %p744_p12 = scmp.ne.s32.totalorder %s742_s21, %s743_s23  ;;  %s747_s29 = scalar_lea.hbm %s1027_s3, 2 }
  0xe0   : > { %p749_p2 = scmp.lt.s32.totalorder %s747_s29, %s743_s23 }
  0xe1   : > { %p745_p13 = pnand %p744_p12, %p881_p4 }
  0xe2   : > { %p750_p3 = por %p749_p2, %p748_p1 }
  0xe3   : > { %p746_p0 = pneg %p745_p13 }
  0xe5   : > { %p751_p5 = pnand %p750_p3, %p746_p0 }
 0x115   : > { %v490_v62 = vpop.permute.xlu2 %489 }
 0x116   : > { %v492_v63 = vadd.f32 %v490_v62, %v487_v44 }
 0x118   : > { %723 = vrsqrt.f32 %v492_v63  ;;  %vm500_vm11 = vcmp.eq.f32.partialorder %v492_v63, inf  ;;  %v503_v22 = vand.u32 2147483648, %v492_v63  ;;  %vm502_vm12 = vcmp.eq.f32.partialorder %v492_v63, 0.0 }
 0x11e   : > { %v724_v1 = vpop.eup %723 }
 0x11f   : > { %v494_v3 = vmul.f32 %v724_v1, %v492_v63 }
 0x121   : > { %v495_v5 = vmul.f32 %v724_v1, %v494_v3 }
 0x123   : > { %v496_v6 = vmul.f32 0.5, %v495_v5 }
 0x125   : > { %v497_v10 = vsub.f32 1.5, %v496_v6 }
 0x127   : > { %v498_v13 = vmul.f32 %v724_v1, %v497_v10 }
 0x129   : > { %v499_v16 = vmul.f32 %v498_v13, %v492_v63 }
 0x12b   : > { %v501_v21 = vsel %vm500_vm11, %v492_v63, %v499_v16 }
 0x12c   : > { %v504_v24 = vsel %vm502_vm12, %v503_v22, %v501_v21 }
 0x12d   : > { %v505_v25 = vmul.f32 0.015625, %v504_v24 }
 0x12f   : > { %v507_v26 = vperm.slane %v505_v25, 0 }
 0x131   : > { %v436_v2 = vpop.permute.xlu1 %435 }
 0x132   : > { %v438_v4 = vadd.f32 %v436_v2, %v433_v48 }
 0x134   : > { %725 = vrsqrt.f32 %v438_v4  ;;  %vm446_vm9 = vcmp.eq.f32.partialorder %v438_v4, inf  ;;  %v449_v17 = vand.u32 2147483648, %v438_v4  ;;  %vm448_vm10 = vcmp.eq.f32.partialorder %v438_v4, 0.0 }
 0x139   : > { %v419_v27 = vpop.permute.xlu2 %418 }
 0x13a   : > { %v726_v7 = vpop.eup %725 }
 0x13b   : > { %v440_v8 = vmul.f32 %v726_v7, %v438_v4 }
 0x13d   : > { %v441_v9 = vmul.f32 %v726_v7, %v440_v8 }
 0x13f   : > { %v442_v11 = vmul.f32 0.5, %v441_v9 }
 0x141   : > { %v443_v12 = vsub.f32 1.5, %v442_v11 }
 0x143   : > { %v444_v14 = vmul.f32 %v726_v7, %v443_v12 }
 0x145   : > { %v445_v15 = vmul.f32 %v444_v14, %v438_v4 }
 0x147   : > { %v447_v18 = vsel %vm446_vm9, %v438_v4, %v445_v15 }
 0x148   : > { %v450_v19 = vsel %vm448_vm10, %v449_v17, %v447_v18 }
 0x149   : > { %v451_v20 = vmul.f32 0.015625, %v450_v19 }
 0x14b   : > { %v453_v23 = vperm.slane %v451_v20, 0 }
 0x14d   : > { %464 = vrot.lane.b32.xlu2 %v453_v23, %s816_s30  ;;  %459 = vrot.lane.b32.xlu1 %v453_v23, %s817_s4 }
 0x14e   : > { %454 = vrot.lane.b32.xlu0 %v453_v23, %s818_s5 }
 0x150   : > { %v409_v28 = vpop.permute.xlu0 %408  ;;  %v414_v29 = vpop.permute.xlu1 %413 }
 0x151   : > { %412 = vst.msk [vmem:[%s969_s27] sm:$0x1] %vm411_vm13, %v409_v28 }
 0x152   : > { %417 = vst.msk [vmem:[%s969_s27] sm:$0x1] %vm416_vm14, %v414_v29 }
 0x153   : > { %422 = vst.msk [vmem:[%s969_s27] sm:$0x1] %vm421_vm15, %v419_v27 }
 0x155   : > { %513 = vrot.lane.b32.xlu1 %v507_v26, %s819_s6 }
 0x156   : > { %508 = vrot.lane.b32.xlu0 %v507_v26, %s820_s7 }
 0x1a7   : > { %v465_v32 = vpop.permute.xlu2 %464 }
 0x1bf   : > { %v460_v30 = vpop.permute.xlu1 %459 }
 0x1c0   : > { %v455_v31 = vpop.permute.xlu0 %454 }
 0x1c1   : > { %458 = vst.msk [vmem:[%s969_s27] sm:$0x1] %vm457_vm0, %v455_v31 }
 0x1c2   : > { %463 = vst.msk [vmem:[%s969_s27] sm:$0x1] %vm462_vm1, %v460_v30 }
 0x1c3   : > { %468 = vst.msk [vmem:[%s969_s27] sm:$0x1] %vm467_vm2, %v465_v32 }
 0x1c7   : > { %v514_v33 = vpop.permute.xlu1 %513 }
 0x1c8   : > { %v509_v34 = vpop.permute.xlu0 %508 }
 0x1c9   : > { %512 = vst.msk [vmem:[%s969_s27] sm:$0x1] %vm511_vm3, %v509_v34 }
 0x1ca   : > { %517 = vst.msk [vmem:[%s969_s27] sm:$0x1] %vm516_vm4, %v514_v33 }
 0x1cb   : > { %754 = shalt.err (!%p751_p5)
}
 0x1cc   : > { %652 = dma.vmem_to_hbm [thread:$0]  (%p881_p4), %s530_s11, 16, %s532_s18, %s519_s19  }
 0x1cd PF: > { %p658_p6 = scmp.ge.s32.totalorder %s805_s17, 2  ;;  %s543_s26 = sand.u32 1, %s785_s12  }
 0x1ce   : > { %s544_s27 = scalar_lea.sflag [#allocation6], %s543_s26 }
 0x1cf   : > { %p655_p7 = pnand %p658_p6, %p888_p8 }
 0x1d1   : > { %p656_p9 = pneg %p655_p7 }
 0x1d3   : > { %780 = dma.done.wait (%p656_p9), %s544_s27, 16  }
 0x1d4   : > { %782 = vsyncadd (%p656_p9), %s544_s27, 4294967280  ;;  %s16_s17 = sadd.s32 1, %s805_s17   ;;  %s1030_s12 = smov %s789_s13 }
 0x1d5   : > { %p13_p10 = scmp.ge.s32.totalorder %s16_s17, 4   ;;  %s1031_s13 = smov %s793_s14 }
 0x1d6   : > { %s1032_s14 = smov %s894_s25  ;;  %s1033_s15 = smov %s801_s16 }
 0x1d7   : > { %s1034_s16 = smov %s1036_s20  ;;  %15 = sbr.rel (!%p13_p10) target bundleno = 4 (0x4), region = 81 }
 0x1dc   :  { %549 = vsyncpa [#allocation6], 1 }
 0x1dd   :  { %551 = vsyncpa [#allocation6 + $0x1], 1 }

</bundles_post_ra>
